<compile_context>
chip_gen: v6e
topology: v6e:2x2x1
jax: 0.10.0
libtpu: 0.0.40
codegen_flags: <defaults>
</compile_context>

<pallas_src>
import jax
import jax.numpy as jnp
from jax.experimental import pallas as pl
from jax.experimental.pallas import tpu as pltpu


def _round_up(x, m):
    return ((x + m - 1) // m) * m


def _cdiv(a, b):
    return (a + b - 1) // b


def _edge_mlp_kernel(src_ref, dst_ref, a_ref, b1_ref, w2_ref, b2_ref,
                     w3_ref, b3_ref, out_ref):
    """Scores one lane-dense tile of edges.

    src_ref : [1, TE]   int32 source-node index per edge (lane-dense)
    dst_ref : [1, TE]   int32 destination-node index per edge
    a_ref   : [F, 2N]   bf16 premultiplied node table [W1s^T h^T | W1d^T h^T]
    b1_ref  : [F, 1]    f32
    w2_ref  : [F, F]    bf16  W2^T
    b2_ref  : [F, 1]    f32
    w3_ref  : [F, 1]    f32   W3 as a column (final layer done as a reduction)
    b3_ref  : [1, 1]    f32 scalar bias (SMEM)
    out_ref : [1, TE]   f32 per-edge scores (lane-dense)
    """
    a = a_ref[...]                                   # [F, 2N] bf16
    two_n = a.shape[1]
    n_nodes = two_n // 2
    te = src_ref.shape[1]

    # Single stacked one-hot [2N, TE]: rows < N select src, rows >= N select dst.
    ids = jax.lax.broadcasted_iota(jnp.int32, (two_n, te), 0)
    target = jnp.where(ids < n_nodes, src_ref[...], dst_ref[...] + n_nodes)
    onehot = (ids == target).astype(jnp.bfloat16)    # exactly representable

    # Layer 1 (gather + W1 fused): one K=2N MXU pass.
    h1 = jnp.dot(a, onehot, preferred_element_type=jnp.float32) + b1_ref[...]
    h1 = jnp.maximum(h1, 0.0)                        # [F, TE] f32

    # Layer 2: relu(W2 h1 + b2), bf16 MXU operands / f32 accumulate.
    h2 = (jnp.dot(w2_ref[...], h1.astype(jnp.bfloat16),
                  preferred_element_type=jnp.float32)
          + b2_ref[...])
    h2 = jnp.maximum(h2, 0.0)                        # [F, TE] f32

    # Layer 3 (output width 1): VPU multiply + sublane reduction (no MXU).
    score = jnp.sum(h2 * w3_ref[...], axis=0, keepdims=True) + b3_ref[0, 0]
    out_ref[...] = score                             # [1, TE] lane-dense store


def mlp_edge_scores(h, src, dst, params, *, tile_e=2048):
    """Scores edges (src[i], dst[i]) with the 3-layer edge MLP -> [E] float32."""
    w1, b1, w2, b2, w3, b3 = params
    n_nodes, feats = h.shape
    n_edges = src.shape[0]

    # Premultiply W1 into the node table (layer 1 folded into the gather):
    #   A = [ (h @ W1_src)^T | (h @ W1_dst)^T ]  -> [F, 2N]
    a_s = (h @ w1[:feats, :]).T                       # [F, N]
    a_d = (h @ w1[feats:, :]).T                       # [F, N]
    a_bf = jnp.concatenate([a_s, a_d], axis=1).astype(jnp.bfloat16)   # [F, 2N]

    w2_bf = w2.T.astype(jnp.bfloat16)                 # [F, F]
    b1_c = b1.reshape(feats, 1).astype(jnp.float32)
    b2_c = b2.reshape(feats, 1).astype(jnp.float32)
    w3_c = w3.reshape(feats, 1).astype(jnp.float32)
    b3_s = b3.reshape(1, 1).astype(jnp.float32)

    # Lane-dense edge tiling: multiple of 128 lanes; cap the tile so small edge
    # counts still yield >= 2 grid steps (lets v7x shard the "parallel" axis
    # across its 2 TensorCores).  Padded edges map to node 0 and are sliced off.
    tile_e = _round_up(tile_e, 128)
    tile = min(tile_e, _round_up(_cdiv(max(n_edges, 1), 2), 128))
    e_pad = _round_up(max(n_edges, 1), tile)
    src_p = jnp.pad(src.astype(jnp.int32), (0, e_pad - n_edges)).reshape(1, e_pad)
    dst_p = jnp.pad(dst.astype(jnp.int32), (0, e_pad - n_edges)).reshape(1, e_pad)

    const = lambda i: (0, 0)
    edge_map = lambda i: (0, i)

    out = pl.pallas_call(
        _edge_mlp_kernel,
        out_shape=jax.ShapeDtypeStruct((1, e_pad), jnp.float32),
        grid_spec=pltpu.PrefetchScalarGridSpec(
            num_scalar_prefetch=0,
            grid=(e_pad // tile,),
            in_specs=[
                pl.BlockSpec((1, tile), edge_map),            # src indices
                pl.BlockSpec((1, tile), edge_map),            # dst indices
                pl.BlockSpec((feats, 2 * n_nodes), const),    # A (bf16, resident)
                pl.BlockSpec((feats, 1), const),              # b1
                pl.BlockSpec((feats, feats), const),          # W2^T (bf16)
                pl.BlockSpec((feats, 1), const),              # b2
                pl.BlockSpec((feats, 1), const),              # W3 column
                pl.BlockSpec(memory_space=pltpu.MemorySpace.SMEM),  # b3 scalar
            ],
            out_specs=pl.BlockSpec((1, tile), edge_map),
        ),
        compiler_params=pltpu.CompilerParams(
            dimension_semantics=("parallel",)),
    )(src_p, dst_p, a_bf, b1_c, w2_bf, b2_c, w3_c, b3_s)

    return out[0, :n_edges]


def model_forward(g_edges, neg_g_edges, x, params, *, tile_e=2048):
    """Equivalent of Model.forward(g, neg_g, x, etype) -> (pos_score, neg_score)."""
    pos_src, pos_dst = g_edges
    neg_src, neg_dst = neg_g_edges
    n_pos = pos_src.shape[0]
    # Single pallas_call for both edge sets (one launch, weights DMA'd once).
    src = jnp.concatenate([pos_src, neg_src])
    dst = jnp.concatenate([pos_dst, neg_dst])
    scores = mlp_edge_scores(x, src, dst, params, tile_e=tile_e)
    return scores[:n_pos], scores[n_pos:]


def init_params(key, h_feats):
    """Deterministic init matching nn.Linear shapes (stored as [in, out])."""
    k1, k2, k3, k4, k5, k6 = jax.random.split(key, 6)
    s1 = 1.0 / jnp.sqrt(2.0 * h_feats)
    s2 = 1.0 / jnp.sqrt(1.0 * h_feats)
    w1 = jax.random.uniform(k1, (2 * h_feats, h_feats), jnp.float32, -s1, s1)
    b1 = jax.random.uniform(k2, (1, h_feats), jnp.float32, -s1, s1)
    w2 = jax.random.uniform(k3, (h_feats, h_feats), jnp.float32, -s2, s2)
    b2 = jax.random.uniform(k4, (1, h_feats), jnp.float32, -s2, s2)
    w3 = jax.random.uniform(k5, (h_feats, 1), jnp.float32, -s2, s2)
    b3 = jax.random.uniform(k6, (1, 1), jnp.float32, -s2, s2)
    return (w1, b1, w2, b2, w3, b3)


if __name__ == "__main__":
    key = jax.random.PRNGKey(0)
    kp, kx, ke1, ke2, ke3, ke4 = jax.random.split(key, 6)

    in_features = 32     # h_feats of MLPPredictor
    num_nodes = 8
    num_pos_edges = 96
    num_neg_edges = 80

    params = init_params(kp, in_features)
    x = jax.random.normal(kx, (num_nodes, in_features), jnp.float32)

    # positive-graph and negative-graph edge lists (src, dst)
    g_edges = (jax.random.randint(ke1, (num_pos_edges,), 0, num_nodes),
               jax.random.randint(ke2, (num_pos_edges,), 0, num_nodes))
    neg_g_edges = (jax.random.randint(ke3, (num_neg_edges,), 0, num_nodes),
                   jax.random.randint(ke4, (num_neg_edges,), 0, num_nodes))

    # 176 edges -> tile auto-caps to 128 lanes -> 2-step "parallel" grid.
    pos_score, neg_score = model_forward(g_edges, neg_g_edges, x, params)
    jax.block_until_ready((pos_score, neg_score))

    # plain-JAX reference (PyTorch MLPPredictor semantics)
    def ref_scores(src, dst):
        w1, b1, w2, b2, w3, b3 = params
        hh = jnp.concatenate([x[src], x[dst]], axis=1)
        hh = jnp.maximum(hh @ w1 + b1, 0.0)
        hh = jnp.maximum(hh @ w2 + b2, 0.0)
        return (hh @ w3 + b3)[:, 0]

    # 1e-2 tolerance: kernel uses bf16 MXU operands (premultiplied W1 table,
    # W2, activations) with f32 accumulation; scores are O(0.1).
    assert jnp.allclose(pos_score, ref_scores(*g_edges), atol=1e-2, rtol=1e-2)
    assert jnp.allclose(neg_score, ref_scores(*neg_g_edges), atol=1e-2, rtol=1e-2)
    assert pos_score.shape == (num_pos_edges,)
    assert neg_score.shape == (num_neg_edges,)

    print("KERNEL_OK")
</pallas_src>

<mosaic_0001>
module attributes {stable_mosaic.version = 11 : i64} {
  func.func @_edge_mlp_kernel(%arg0: i32, %arg1: memref<1x128xi32, #tpu.memory_space<vmem>>, %arg2: memref<1x128xi32, #tpu.memory_space<vmem>>, %arg3: memref<32x16xbf16, #tpu.memory_space<vmem>>, %arg4: memref<32x1xf32, #tpu.memory_space<vmem>>, %arg5: memref<32x32xbf16, #tpu.memory_space<vmem>>, %arg6: memref<32x1xf32, #tpu.memory_space<vmem>>, %arg7: memref<32x1xf32, #tpu.memory_space<vmem>>, %arg8: memref<1x1xf32, #tpu.memory_space<smem>>, %arg9: memref<1x128xf32, #tpu.memory_space<vmem>>) attributes {dimension_semantics = [#tpu.dimension_semantics<parallel>], iteration_bounds = array<i64: 2>, scalar_prefetch = 0 : i64, scratch_operands = 0 : i64, tpu.core_type = #tpu.core_type<tc>, window_params = [{transform_indices = @transform_0, window_bounds = array<i64: 1, 128>}, {transform_indices = @transform_1, window_bounds = array<i64: 1, 128>}, {pipeline_mode = #tpu.pipeline_mode<synchronous>, transform_indices = @transform_2, window_bounds = array<i64: 32, 16>}, {pipeline_mode = #tpu.pipeline_mode<synchronous>, transform_indices = @transform_3, window_bounds = array<i64: 32, 1>}, {pipeline_mode = #tpu.pipeline_mode<synchronous>, transform_indices = @transform_4, window_bounds = array<i64: 32, 32>}, {pipeline_mode = #tpu.pipeline_mode<synchronous>, transform_indices = @transform_5, window_bounds = array<i64: 32, 1>}, {pipeline_mode = #tpu.pipeline_mode<synchronous>, transform_indices = @transform_6, window_bounds = array<i64: 32, 1>}, {transform_indices = @transform_7, window_bounds = array<i64: 1, 1>}, {transform_indices = @transform_8, window_bounds = array<i64: 1, 128>}]} {
    %c0 = arith.constant 0 : index
    %c0_0 = arith.constant 0 : index
    %0 = vector.load %arg3[%c0, %c0_0] : memref<32x16xbf16, #tpu.memory_space<vmem>>, vector<32x16xbf16>
    %1 = tpu.iota {dimensions = array<i32: 0>} : vector<16x128xi32>
    %c8_i32 = arith.constant 8 : i32
    %2 = vector.broadcast %c8_i32 : i32 to vector<16x128xi32>
    %3 = arith.cmpi slt, %1, %2 : vector<16x128xi32>
    %c0_1 = arith.constant 0 : index
    %c0_2 = arith.constant 0 : index
    %4 = vector.load %arg1[%c0_1, %c0_2] : memref<1x128xi32, #tpu.memory_space<vmem>>, vector<1x128xi32>
    %c0_3 = arith.constant 0 : index
    %c0_4 = arith.constant 0 : index
    %5 = vector.load %arg2[%c0_3, %c0_4] : memref<1x128xi32, #tpu.memory_space<vmem>>, vector<1x128xi32>
    %c8_i32_5 = arith.constant 8 : i32
    %6 = vector.broadcast %c8_i32_5 : i32 to vector<1x128xi32>
    %7 = arith.addi %5, %6 : vector<1x128xi32>
    %8 = vector.shape_cast %4 : vector<1x128xi32> to vector<1x128xi32>
    %9 = vector.broadcast %8 : vector<1x128xi32> to vector<16x128xi32>
    %10 = vector.shape_cast %7 : vector<1x128xi32> to vector<1x128xi32>
    %11 = vector.broadcast %10 : vector<1x128xi32> to vector<16x128xi32>
    %12 = arith.select %3, %9, %11 : vector<16x128xi1>, vector<16x128xi32>
    %13 = arith.cmpi eq, %1, %12 : vector<16x128xi32>
    %14 = arith.extui %13 : vector<16x128xi1> to vector<16x128xi32>
    %15 = arith.sitofp %14 : vector<16x128xi32> to vector<16x128xf32>
    %16 = arith.truncf %15 : vector<16x128xf32> to vector<16x128xbf16>
    %cst = arith.constant dense<0.000000e+00> : vector<32x128xf32>
    %17 = tpu.matmul %0, %16, %cst {dimension_numbers = #tpu.dot_dimension_numbers<[1], [0], [0], [1], [0, 0, 1, 1], [], []>} : vector<32x16xbf16>, vector<16x128xbf16>, vector<32x128xf32> -> vector<32x128xf32>
    %c0_6 = arith.constant 0 : index
    %c0_7 = arith.constant 0 : index
    %18 = vector.load %arg4[%c0_6, %c0_7] : memref<32x1xf32, #tpu.memory_space<vmem>>, vector<32x1xf32>
    %19 = vector.broadcast %18 : vector<32x1xf32> to vector<32x128xf32>
    %20 = arith.addf %17, %19 : vector<32x128xf32>
    %cst_8 = arith.constant 0.000000e+00 : f32
    %21 = vector.broadcast %cst_8 : f32 to vector<32x128xf32>
    %22 = arith.maximumf %20, %21 : vector<32x128xf32>
    %c0_9 = arith.constant 0 : index
    %c0_10 = arith.constant 0 : index
    %23 = vector.load %arg5[%c0_9, %c0_10] : memref<32x32xbf16, #tpu.memory_space<vmem>>, vector<32x32xbf16>
    %24 = arith.truncf %22 : vector<32x128xf32> to vector<32x128xbf16>
    %cst_11 = arith.constant dense<0.000000e+00> : vector<32x128xf32>
    %25 = tpu.matmul %23, %24, %cst_11 {dimension_numbers = #tpu.dot_dimension_numbers<[1], [0], [0], [1], [0, 0, 1, 1], [], []>} : vector<32x32xbf16>, vector<32x128xbf16>, vector<32x128xf32> -> vector<32x128xf32>
    %c0_12 = arith.constant 0 : index
    %c0_13 = arith.constant 0 : index
    %26 = vector.load %arg6[%c0_12, %c0_13] : memref<32x1xf32, #tpu.memory_space<vmem>>, vector<32x1xf32>
    %27 = vector.broadcast %26 : vector<32x1xf32> to vector<32x128xf32>
    %28 = arith.addf %25, %27 : vector<32x128xf32>
    %cst_14 = arith.constant 0.000000e+00 : f32
    %29 = vector.broadcast %cst_14 : f32 to vector<32x128xf32>
    %30 = arith.maximumf %28, %29 : vector<32x128xf32>
    %c0_15 = arith.constant 0 : index
    %c0_16 = arith.constant 0 : index
    %31 = vector.load %arg7[%c0_15, %c0_16] : memref<32x1xf32, #tpu.memory_space<vmem>>, vector<32x1xf32>
    %32 = vector.broadcast %31 : vector<32x1xf32> to vector<32x128xf32>
    %33 = arith.mulf %30, %32 : vector<32x128xf32>
    %cst_17 = arith.constant dense<0.000000e+00> : vector<128xf32>
    %34 = vector.multi_reduction <add>, %33, %cst_17 [0] : vector<32x128xf32> to vector<128xf32>
    %35 = vector.shape_cast %34 : vector<128xf32> to vector<1x128xf32>
    %c0_18 = arith.constant 0 : index
    %c0_19 = arith.constant 0 : index
    %36 = memref.load %arg8[%c0_18, %c0_19] : memref<1x1xf32, #tpu.memory_space<smem>>
    %37 = vector.broadcast %36 : f32 to vector<1x128xf32>
    %38 = arith.addf %35, %37 : vector<1x128xf32>
    %c0_20 = arith.constant 0 : index
    %c0_21 = arith.constant 0 : index
    %39 = vector.load %arg9[%c0_20, %c0_21] : memref<1x128xf32, #tpu.memory_space<vmem>>, vector<1x128xf32>
    tpu.vector_store %arg9[%c0_20, %c0_21], %38 {strides = array<i32>} : memref<1x128xf32, #tpu.memory_space<vmem>>, vector<1x128xf32>,
    return
  }
  func.func @transform_0(%arg0: i32) -> (i32, i32) {
    %c0_i32 = arith.constant 0 : i32
    %c0_i32_0 = arith.constant 0 : i32
    return %c0_i32, %arg0 : i32, i32
  }
  func.func @transform_1(%arg0: i32) -> (i32, i32) {
    %c0_i32 = arith.constant 0 : i32
    %c0_i32_0 = arith.constant 0 : i32
    return %c0_i32, %arg0 : i32, i32
  }
  func.func @transform_2(%arg0: i32) -> (i32, i32) {
    %c0_i32 = arith.constant 0 : i32
    %c0_i32_0 = arith.constant 0 : i32
    %c0_i32_1 = arith.constant 0 : i32
    return %c0_i32, %c0_i32_0 : i32, i32
  }
  func.func @transform_3(%arg0: i32) -> (i32, i32) {
    %c0_i32 = arith.constant 0 : i32
    %c0_i32_0 = arith.constant 0 : i32
    %c0_i32_1 = arith.constant 0 : i32
    return %c0_i32, %c0_i32_0 : i32, i32
  }
  func.func @transform_4(%arg0: i32) -> (i32, i32) {
    %c0_i32 = arith.constant 0 : i32
    %c0_i32_0 = arith.constant 0 : i32
    %c0_i32_1 = arith.constant 0 : i32
    return %c0_i32, %c0_i32_0 : i32, i32
  }
  func.func @transform_5(%arg0: i32) -> (i32, i32) {
    %c0_i32 = arith.constant 0 : i32
    %c0_i32_0 = arith.constant 0 : i32
    %c0_i32_1 = arith.constant 0 : i32
    return %c0_i32, %c0_i32_0 : i32, i32
  }
  func.func @transform_6(%arg0: i32) -> (i32, i32) {
    %c0_i32 = arith.constant 0 : i32
    %c0_i32_0 = arith.constant 0 : i32
    %c0_i32_1 = arith.constant 0 : i32
    return %c0_i32, %c0_i32_0 : i32, i32
  }
  func.func @transform_7(%arg0: i32) -> (i32, i32) {
    %c0_i32 = arith.constant 0 : i32
    %c0_i32_0 = arith.constant 0 : i32
    %c0_i32_1 = arith.constant 0 : i32
    return %c0_i32, %c0_i32_0 : i32, i32
  }
  func.func @transform_8(%arg0: i32) -> (i32, i32) {
    %c0_i32 = arith.constant 0 : i32
    %c0_i32_0 = arith.constant 0 : i32
    return %c0_i32, %arg0 : i32, i32
  }
}

</mosaic_0001>

<bundles_post_ra>
// kernel: tpu_custom_call.1
= control target key start
LH: loop header
LB: loop body
LE: loop exit
PB: predicated region body
PF: predicated region fallthrough
CT: control target
= control target key end

     0   :  { %s994_s0 = inlined_call_operand.vmem [shape: s32[1,256], index: 0, kind: input, shape index: {}]   ;;  %s995_s1 = inlined_call_operand.vmem [shape: s32[1,256], index: 1, kind: input, shape index: {}]   ;;  %s996_s2 = inlined_call_operand.vmem [shape: bf16[32,16], index: 2, kind: input, shape index: {}]   ;;  %s997_s3 = inlined_call_operand.vmem [shape: f32[32,1], index: 3, kind: input, shape index: {}]   ;;  %s998_s4 = inlined_call_operand.vmem [shape: bf16[32,32], index: 4, kind: input, shape index: {}]   ;;  %s999_s5 = inlined_call_operand.vmem [shape: f32[32,1], index: 5, kind: input, shape index: {}]   ;;  %s1000_s6 = inlined_call_operand.vmem [shape: f32[32,1], index: 6, kind: input, shape index: {}]   ;;  %s1001_s7 = inlined_call_operand.<no memory space> [shape: f32[1,1], index: 7, kind: input, shape index: {}]   ;;  %s1002_s8 = inlined_call_operand.hbm [shape: f32[1,256], index: 8, kind: output, shape index: {}]  }
   0x1   :  { %13 = sst [smem:[#allocation2]] %s1001_s7 }
   0x2   :  { %14 = vsyncpa [#allocation4], 0 }
   0x3   :  { %16 = vsyncpa [#allocation4 + $0x1], 0  ;;  %s852_s29 = smov 0   ;;  %s854_s30 = smov 0  }
   0x4   :  { %s856_s9 = smov 0   ;;  %s858_s10 = smov 0  }
   0x5 LB: > { %s873_s7 = sadd.s32 4294967295, %s799_s10   ;;  %s651_s11 = sadd.s32 4294967294, %s799_s10   ;;  %s799_s10 = sphi %s858_s10, %s1008_s10   ;;  %s795_s9 = sphi %s856_s9, %s1007_s9   ;;  %s791_s30 = sphi %s854_s30, %s1006_s30   ;;  %s787_s29 = sphi %s852_s29, %s1005_s29  }
   0x6   : > { %s877_s12 = sadd.s32 1, %s799_s10   ;;  %s207_s13 = sadd.s32 1, %s795_s9 }
   0x7   : > { %s204_s14 = ssub.s32 %s799_s10, %s877_s12  ;;  %p217_p0 = scmp.ne.s32.totalorder %s795_s9, %s791_s30 }
   0x8   : > { %p205_p1 = scmp.eq.s32.totalorder %s204_s14, 0  ;;  %p218_p2 = scmp.eq.s32.totalorder %s873_s7, 1 }
   0x9   : > { %p223_p3 = scmp.ne.s32.totalorder %s791_s30, %s787_s29  ;;  %p224_p4 = scmp.eq.s32.totalorder %s651_s11, 1 }
   0xa   : > { %s888_s15 = scalar_select %p205_p1, %s795_s9, %s207_s13  }
   0xb   : > { %p890_p5 = por %p218_p2, %p217_p0  ;;  %p894_p6 = por %p224_p4, %p223_p3 }
   0xc   : > { %p654_p7 = scmp.ge.s32.totalorder %s799_s10, 1  ;;  %p272_p8 = scmp.lt.s32.totalorder %s799_s10, 3 }
   0xe   : > { %p273_p9 = pnand %p654_p7, %p272_p8 }
   0xf   : > { %p306_p10 = scmp.lt.s32.totalorder (!%p273_p9), %s873_s7, 1  ;;  %s573_s11 = sld [smem:[#allocation2]] (!%p273_p9) }
  0x10   : > { %276 = sbr.rel (%p273_p9) target bundleno = 485 (0x1e5), region = 52  ;;  %s668_s14 = sshll.u32 (!%p273_p9), %s873_s7, 4 }
  0x11   : > { %s588_s22 = scalar_lea.hbm (!%p273_p9), %s1002_s8, %s668_s14  ;;  %s803_s25 = smov (!%p273_p9), [#allocation3]  }
  0x12   : > { %s743_s26 = sshll.u32 (!%p273_p9), %s803_s25, 4  ;;  %s744_s26 = int_to_ptr.vmem [resolvable:$false] %s743_s26 }
  0x15   : > { %v317_v0 = vlaneseq  ;;  %v735_v1 = vld [vmem:[%s996_s2] sm:$0xff]   ;;  %vm376_vm0 = vcmask 130048   ;;  %s307_s20 = scalar_select %p306_p10, %s873_s7, 1  ;;  %v344_v3 = vld [vmem:[%s997_s3 + $0x10] sm:$0xff]  ;;  %v801_v4 = vmov 0   ;;  %v345_v7 = vld [vmem:[%s997_s3 + $0x18] sm:$0xff] }
  0x16   : > { %680 = vmatprep.mubr.msk.bf16.mxu0 %vm376_vm0, %v735_v1  ;;  %733 = vset.pattern.permute.xlu0 %v801_v4  ;;  %v342_v5 = vld [vmem:[%s997_s3] sm:$0xff]  ;;  %v343_v10 = vld [vmem:[%s997_s3 + $0x8] sm:$0xff]  ;;  %v802_v16 = vmov 1.0|1.0   ;;  %v444_v18 = vld [vmem:[%s999_s5 + $0x10] sm:$0xff]  ;;  %vm476_vm4 = vcmask 261120  }
  0x17   : > { %v318_v2 = vshrl.u32 %v317_v0, 7  ;;  %734 = vset.pattern.permute.xlu1 %v801_v4  ;;  %s308_s27 = scalar_lea.vmem %s994_s0, %s307_s20  ;;  %s311_s13 = scalar_lea.vmem %s995_s1, %s307_s20  ;;  %358 = vperm.xlu0 %733, %v344_v3   ;;  %v442_v14 = vld [vmem:[%s999_s5] sm:$0xff]  ;;  %v443_v15 = vld [vmem:[%s999_s5 + $0x8] sm:$0xff]  ;;  %v445_v19 = vld [vmem:[%s999_s5 + $0x18] sm:$0xff] }
  0x18   : > { %348 = vperm.xlu1 %734, %v342_v5   ;;  %v655_v8 = vld [vmem:[%s308_s27] ss:$0 sm:$0xff]  ;;  %v736_v17 = vld [vmem:[%s996_s2 + $0x8] sm:$0xff]   ;;  %v538_v22 = vld [vmem:[%s1000_s6 + $0x10] sm:$0xff]  ;;  %s745_s7 = scalar_lea.vmem %s744_s26, 32 }
  0x19   : > { %v331_v6 = vsub.s32 0, %v318_v2  ;;  %v323_v9 = vld [vmem:[%s311_s13] sm:$0x1]  ;;  %v319_v11 = vadd.s32 8, %v318_v2  ;;  %vm335_vm1 = vcmp.eq.s32.totalorder %v318_v2, %v655_v8  ;;  %v537_v21 = vld [vmem:[%s1000_s6 + $0x8] sm:$0xff]  ;;  %v539_v23 = vld [vmem:[%s1000_s6 + $0x18] sm:$0xff] }
  0x1a   : > { %v324_v12 = vadd.s32 8, %v323_v9  ;;  %v536_v20 = vld [vmem:[%s1000_s6] sm:$0xff]  ;;  %v738_v43 = vld [vmem:[%s998_s4 + $0x8] sm:$0xff]   ;;  %s304_s13 = sand.u32 1, %s791_s30  }
  0x1b   : > { %363 = vperm.xlu0 %733, %v345_v7   ;;  %v737_v24 = vld [vmem:[%s998_s4] sm:$0xff]   ;;  %s305_s18 = scalar_lea.vmem [#allocation3], %s304_s13  ;;  %s578_s23 = scalar_lea.sflag [#allocation4], %s304_s13 }
  0x1c   : > { %v332_v13 = vrot.slane %v324_v12, %v331_v6  ;;  %353 = vperm.xlu1 %734, %v343_v10   ;;  %688 = vmatprep.mubr.msk.bf16.mxu1 %vm476_vm4, %v737_v24  ;;  %v574_v12 = vstv %s573_s11  ;;  %s590_s19 = sshll.u32 %s305_s18, 4  ;;  %s591_s19 = int_to_ptr.vmem [resolvable:$true] %s590_s19 }
  0x1d   : > { %s739_s24 = scalar_lea.vmem %s591_s19, 16  ;;  %p746_p0 = scmp.lt.s32.totalorder %s591_s19, %s744_s26 }
  0x1e   : > { %vm336_vm2 = vcmp.eq.s32.totalorder %v319_v11, %v332_v13  ;;  %p740_p11 = scmp.ne.s32.totalorder %s591_s19, %s739_s24  ;;  %p747_p1 = scmp.lt.s32.totalorder %s745_s7, %s739_s24 }
  0x1f   : > { %vm660_vm3 = vmpackc.low %vm336_vm2, %vm335_vm1  ;;  %448 = vperm.xlu0 %733, %v442_v14  }
  0x20   : > { %678 = vmatprep.subr.msk.bf16.mxu0 %vm660_vm3, %v802_v16  ;;  %453 = vperm.xlu1 %734, %v443_v15   ;;  %p741_p12 = pnand %p740_p11, %p890_p5  ;;  %p748_p2 = por %p747_p1, %p746_p0 }
  0x21   : > { %679 = vmatpush3.bf16.msk.msra.mxu0 %vm660_vm3, %v802_v16 }
  0x22   : > { %p742_p13 = pneg %p741_p12 }
  0x23   : > { %458 = vperm.xlu0 %733, %v444_v18  }
  0x24   : > { %681 = vmatmul.mubr.msk.bf16.vlgmr.msra.gmra.mxu0 %vm376_vm0, %v736_v17  ;;  %463 = vperm.xlu1 %734, %v445_v19   ;;  %p749_p3 = pnand %p748_p2, %p742_p13 }
  0x27   : > { %542 = vperm.xlu0 %733, %v536_v20  }
  0x28   : > { %547 = vperm.xlu1 %734, %v537_v21  }
  0x2b   : > { %552 = vperm.xlu0 %733, %v538_v22  }
  0x2c   : > { %557 = vperm.xlu1 %734, %v539_v23  }
  0x92   : > { %v359_v25 = vpop.permute.xlu0 %358 }
  0x93   : > { %v349_v26 = vpop.permute.xlu1 %348 }
  0x96   : > { %v364_v30 = vpop.permute.xlu0 %363 }
  0x97   : > { %v354_v34 = vpop.permute.xlu1 %353 }
  0x9a   : > { %v449_v44 = vpop.permute.xlu0 %448 }
  0x9b   : > { %v454_v45 = vpop.permute.xlu1 %453 }
  0x9e   : > { %v459_v46 = vpop.permute.xlu0 %458 }
  0x9f   : > { %v464_v48 = vpop.permute.xlu1 %463 }
  0xa2   : > { %v543_v53 = vpop.permute.xlu0 %542 }
  0xa3   : > { %v548_v58 = vpop.permute.xlu1 %547 }
  0xa6   : > { %v553_v0 = vpop.permute.xlu0 %552 }
  0xa7   : > { %v558_v3 = vpop.permute.xlu1 %557 }
  0xe4   : > { %v682_v27 = vpop.f32.mrf.mxu0 }
  0xe5   : > { %v426_v29 = vadd.f32 %v682_v27, %v359_v25 }
  0xe6   : > { %v417_v28 = vpop.f32.mrf.mxu0 }
  0xe7   : > { %v418_v32 = vadd.f32 %v417_v28, %v349_v26  ;;  %v434_v36 = vmax.f32 %v426_v29, 0.0 }
  0xe8   : > { %v683_v31 = vpop.f32.mrf.mxu0 }
  0xe9   : > { %v429_v33 = vadd.f32 %v683_v31, %v364_v30  ;;  %v432_v39 = vmax.f32 %v418_v32, 0.0 }
  0xea   : > { %v420_v35 = vpop.f32.mrf.mxu0 }
  0xeb   : > { %v435_v37 = vmax.f32 %v429_v33, 0.0  ;;  %v421_v38 = vadd.f32 %v420_v35, %v354_v34 }
  0xed   : > { %v433_v40 = vmax.f32 %v421_v38, 0.0  ;;  %v441_v41 = vpack.c.bf16 %v435_v37, %v434_v36 }
  0xef   : > { %v440_v42 = vpack.c.bf16 %v433_v40, %v432_v39  ;;  %684 = vmatprep.subr.bf16.mxu1 %v441_v41 }
  0xf0   : > { %685 = vmatpush3.bf16.msra.mxu1 %v441_v41 }
  0xf1   : > { %686 = vmatprep.subr.bf16.mxu1 %v440_v42 }
  0xf4   : > { %687 = vmatpush3.bf16.msra.mxu1 %v440_v42 }
  0xf7   : > { %689 = vmatmul.mubr.msk.bf16.vlgmr.msra.gmra.mxu1 %vm476_vm4, %v738_v43 }
 0x1b7   : > { %v690_v47 = vpop.f32.mrf.mxu1 }
 0x1b8   : > { %v526_v52 = vadd.f32 %v690_v47, %v459_v46 }
 0x1b9   : > { %v517_v49 = vpop.f32.mrf.mxu1 }
 0x1ba   : > { %v518_v50 = vadd.f32 %v517_v49, %v449_v44  ;;  %v534_v59 = vmax.f32 %v526_v52, 0.0 }
 0x1bb   : > { %v691_v51 = vpop.f32.mrf.mxu1 }
 0x1bc   : > { %v532_v55 = vmax.f32 %v518_v50, 0.0  ;;  %v529_v56 = vadd.f32 %v691_v51, %v464_v48  ;;  %v562_v1 = vmul.f32 %v553_v0, %v534_v59 }
 0x1bd   : > { %v520_v54 = vpop.f32.mrf.mxu1 }
 0x1be   : > { %v521_v57 = vadd.f32 %v520_v54, %v454_v45  ;;  %v560_v61 = vmul.f32 %v543_v53, %v532_v55  ;;  %v535_v62 = vmax.f32 %v529_v56, 0.0 }
 0x1c0   : > { %v533_v60 = vmax.f32 %v521_v57, 0.0  ;;  %v563_v4 = vmul.f32 %v558_v3, %v535_v62 }
 0x1c2   : > { %v561_v63 = vmul.f32 %v548_v58, %v533_v60 }
 0x1c4   : > { %v564_v2 = vadd.f32 %v561_v63, %v560_v61 }
 0x1c6   : > { %v565_v5 = vadd.f32 %v564_v2, %v562_v1 }
 0x1c8   : > { %v566_v6 = vadd.f32 %v565_v5, %v563_v4 }
 0x1ca   : > { %v567_v7 = vrot.slane %v566_v6, 4 }
 0x1cc   : > { %v568_v8 = vadd.f32 %v567_v7, %v566_v6 }
 0x1ce   : > { %v569_v9 = vrot.slane %v568_v8, 2 }
 0x1d0   : > { %v570_v10 = vadd.f32 %v569_v9, %v568_v8 }
 0x1d2   : > { %v571_v11 = vrot.slane %v570_v10, 1 }
 0x1d4   : > { %v572_v13 = vadd.f32 %v571_v11, %v570_v10 }
 0x1d6   : > { %v575_v14 = vadd.f32 %v574_v12, %v572_v13 }
 0x1d8   : > { %576 = vst [vmem:[%s305_s18] sm:$0x1] %v575_v14 }
 0x1d9   : > { %752 = shalt.err (!%p749_p3)
}
 0x1da   : > { %s753_s27 = scalar_lea.hbm %s588_s22, 16  ;;  %s757_s13 = scalar_lea.hbm %s1002_s8, 32 }
 0x1db   : > { %p754_p4 = scmp.ne.s32.totalorder %s588_s22, %s753_s27  ;;  %p758_p9 = scmp.lt.s32.totalorder %s588_s22, %s1002_s8 }
 0x1dc   : > { %p759_p10 = scmp.lt.s32.totalorder %s757_s13, %s753_s27 }
 0x1dd   : > { %p755_p7 = pnand %p754_p4, %p890_p5 }
 0x1de   : > { %p760_p11 = por %p759_p10, %p758_p9 }
 0x1df   : > { %p756_p8 = pneg %p755_p7 }
 0x1e1   : > { %p761_p12 = pnand %p760_p11, %p756_p8 }
 0x1e3   : > { %764 = shalt.err (!%p761_p12)
}
 0x1e4   : > { %692 = dma.vmem_to_hbm [thread:$0]  (%p890_p5), %s591_s19, 16, %s588_s22, %s578_s23  }
 0x1e5 PF: > { %p698_p13 = scmp.ge.s32.totalorder %s799_s10, 2  ;;  %s602_s21 = sand.u32 1, %s787_s29  }
 0x1e6   : > { %s603_s20 = scalar_lea.sflag [#allocation4], %s602_s21 }
 0x1e7   : > { %p695_p0 = pnand %p698_p13, %p894_p6 }
 0x1e9   : > { %p696_p1 = pneg %p695_p0 }
 0x1eb   : > { %782 = dma.done.wait (%p696_p1), %s603_s20, 16  }
 0x1ec   : > { %784 = vsyncadd (%p696_p1), %s603_s20, 4294967280  ;;  %p19_p2 = scmp.ge.s32.totalorder %s877_s12, 4   ;;  %s1005_s29 = smov %s791_s30 }
 0x1ed   : > { %s1006_s30 = smov %s795_s9  ;;  %s1007_s9 = smov %s888_s15 }
 0x1ee   : > { %s1008_s10 = smov %s877_s12  ;;  %21 = sbr.rel (!%p19_p2) target bundleno = 5 (0x5), region = 90 }
 0x1f3   :  { %607 = vsyncpa [#allocation4], 1 }
 0x1f4   :  { %609 = vsyncpa [#allocation4 + $0x1], 1 }

</bundles_post_ra>
